<compile_context>
chip_gen: v7x
topology: tpu7x:2x2x1
jax: 0.10.0
libtpu: 0.0.40
codegen_flags: <defaults>
</compile_context>

<pallas_src>
import functools

import jax
import jax.numpy as jnp
from jax.experimental import pallas as pl
from jax.experimental.pallas import tpu as pltpu


def _round_up(x, m):
    return ((x + m - 1) // m) * m


def _lq_loss_kernel(pred_ref, lab_ref, out_ref, *, q, inv_q):
    x = pred_ref[...].astype(jnp.float32)                      # (TN, C) f32

    # Numerically stable softmax pieces (no full-tile normalization).
    m = jnp.max(x, axis=-1, keepdims=True)                     # (TN, 1)
    e = jnp.exp(x - m)                                         # (TN, C)
    denom = jnp.sum(e, axis=-1, keepdims=True)                 # (TN, 1)

    # Fused one-hot gather: e_y[r] = e[r, labels[r]] (no onehot materialize).
    cls_ids = jax.lax.broadcasted_iota(jnp.int32, x.shape, 1)  # (TN, C)
    labels = lab_ref[...]                                      # (TN, 1) int32
    e_y = jnp.sum(jnp.where(cls_ids == labels, e, 0.0),
                  axis=-1, keepdims=True)                      # (TN, 1)

    # p_y = softmax(x)[row, label] + 1e-8   (one exact reciprocal per row)
    p_y = e_y * pl.reciprocal(denom) + 1e-8                    # (TN, 1)

    if q == 0.5:
        p_pow = jnp.sqrt(p_y)                                  # single EUP op
    else:
        p_pow = jnp.exp(jnp.float32(q) * jnp.log(p_y))
    loss = (1.0 - p_pow) * jnp.float32(inv_q)                  # (TN, 1)

    # Lane-dense writeback: the whole (8,128) block carries this tile's sum.
    out_ref[...] = jnp.full((8, 128), jnp.sum(loss), jnp.float32)


def _vmem_budgets():
    """Returns (vmem_limit_bytes, live_vmem_budget_for_tile_sizing)."""
    try:
        cap = int(pltpu.get_tpu_info().vmem_capacity_bytes)
    except Exception:
        cap = None
    if cap is None or cap <= 96 * 1024 * 1024:
        # v7x (64 MiB per TensorCore) or unknown generation: conservative.
        return 40 * 1024 * 1024, 20 * 1024 * 1024
    # v5e / v6e (128 MiB VMEM): larger tiles, higher scoped limit.
    return 64 * 1024 * 1024, 32 * 1024 * 1024


def _choose_tile_n(n, c, itemsize, live_budget):
    """Batch-tile rows from a per-row live-VMEM byte model (not a row cap)."""
    align = 16 if itemsize < 4 else 8          # sublane alignment (packed dtypes)
    # Per-row live VMEM: double-buffered pred block + lane-padded (x128)
    # double-buffered labels block + ~4 full-width f32 intermediates
    # (x, e, cls_ids, masked e) + a few lane-sparse (TN,1) temporaries.
    per_row = 2 * c * itemsize + 2 * 128 * 4 + 4 * c * 4 + 4 * 128 * 4
    tile_n = max(align, (live_budget // per_row) // align * align)
    tile_n = min(tile_n, 8192)
    # Keep >= 2 grid steps when possible so the parallel axis feeds both v7x TCs.
    half = _round_up(max(1, -(-n // 2)), align)
    tile_n = min(tile_n, max(align, half))
    return min(tile_n, _round_up(n, align))


def lq_loss(pred, labels, num_classes, q=0.5, *, tile_n=None):
    """pred: (N, C) float (f32 or bf16), labels: (N,) int. Scalar mean Lq loss."""
    n, c = pred.shape
    assert c == num_classes
    qf = float(q)
    itemsize = jnp.dtype(pred.dtype).itemsize
    align = 16 if itemsize < 4 else 8
    vmem_limit, live_budget = _vmem_budgets()

    if tile_n is None:
        tile_n = _choose_tile_n(n, c, itemsize, live_budget)
    else:
        # Validate user tile: multiple of the sublane alignment, <= padded N.
        tile_n = max(align, _round_up(int(tile_n), align))
        tile_n = min(tile_n, _round_up(n, align))

    # Pad batch to a multiple of tile_n; padded rows are all-zero logits with
    # label 0 and their exact contribution is removed in the wrapper.
    n_pad = (-n) % tile_n
    labels2d = labels.astype(jnp.int32).reshape(n, 1)
    if n_pad:
        pred = jnp.pad(pred, ((0, n_pad), (0, 0)))
        labels2d = jnp.pad(labels2d, ((0, n_pad), (0, 0)))
    num_tiles = (n + n_pad) // tile_n

    kernel = functools.partial(_lq_loss_kernel, q=qf, inv_q=1.0 / qf)

    partials = pl.pallas_call(
        kernel,
        out_shape=jax.ShapeDtypeStruct((num_tiles * 8, 128), jnp.float32),
        grid_spec=pltpu.PrefetchScalarGridSpec(
            num_scalar_prefetch=0,
            grid=(num_tiles,),
            in_specs=[
                pl.BlockSpec((tile_n, c), lambda i: (i, 0)),   # pred tile
                pl.BlockSpec((tile_n, 1), lambda i: (i, 0)),   # labels tile
            ],
            out_specs=pl.BlockSpec((8, 128), lambda i: (i, 0)),
        ),
        compiler_params=pltpu.CompilerParams(
            dimension_semantics=("parallel",),
            vmem_limit_bytes=vmem_limit,
        ),
    )(pred, labels2d)

    # One partial sum per tile (block was a broadcast of the tile sum).
    total = jnp.sum(partials[::8, 0])

    if n_pad:
        # Zero-padded rows: softmax is uniform, p = 1/C + 1e-8; subtract their
        # known constant loss (computed with the kernel's f32 formula).
        pad_p = 1.0 / jnp.float32(c) + jnp.float32(1e-8)
        if qf == 0.5:
            pad_pow = jnp.sqrt(pad_p)
        else:
            pad_pow = jnp.exp(jnp.float32(qf) * jnp.log(pad_p))
        pad_loss = (1.0 - pad_pow) * jnp.float32(1.0 / qf)
        total = total - jnp.float32(n_pad) * pad_loss

    return total / jnp.float32(n)


def _lq_loss_ref(pred, labels, num_classes, q=0.5):
    one_hot = jax.nn.one_hot(labels, num_classes, dtype=jnp.float32)
    p = jax.nn.softmax(pred.astype(jnp.float32), axis=1) + 1e-8
    p_y = jnp.sum(one_hot * p, axis=1)
    return jnp.mean((1.0 - p_y ** q) / q)


if __name__ == "__main__":
    key = jax.random.PRNGKey(0)
    k1, k2, k3, k4 = jax.random.split(key, 4)

    # Case 1: f32, q = 0.5, batch that splits into 2 tiles exactly.
    N, C = 16, 32
    pred = jax.random.normal(k1, (N, C), dtype=jnp.float32)
    labels = jax.random.randint(k2, (N,), 0, C, dtype=jnp.int32)
    out = jax.block_until_ready(lq_loss(pred, labels, num_classes=C, q=0.5))
    ref = _lq_loss_ref(pred, labels, C, q=0.5)
    assert jnp.allclose(out, ref, atol=1e-5, rtol=1e-5), (out, ref)

    # Case 2: f32, q = 0.7 (exp/log path), N not a multiple of the tile
    # (exercises the wrapper-side pad-loss correction).
    N2, C2 = 50, 32
    pred2 = jax.random.normal(k3, (N2, C2), dtype=jnp.float32)
    labels2 = jax.random.randint(k4, (N2,), 0, C2, dtype=jnp.int32)
    out2 = jax.block_until_ready(lq_loss(pred2, labels2, num_classes=C2, q=0.7))
    ref2 = _lq_loss_ref(pred2, labels2, C2, q=0.7)
    assert jnp.allclose(out2, ref2, atol=1e-5, rtol=1e-5), (out2, ref2)

    # Case 3: bf16 logits (halved HBM bytes, upcast to f32 in-kernel), q = 0.5,
    # ragged batch with 16-sublane tile alignment.
    pred3 = pred2.astype(jnp.bfloat16)
    out3 = jax.block_until_ready(lq_loss(pred3, labels2, num_classes=C2, q=0.5))
    ref3 = _lq_loss_ref(pred3, labels2, C2, q=0.5)
    assert jnp.allclose(out3, ref3, atol=1e-5, rtol=1e-5), (out3, ref3)

    print("KERNEL_OK")
</pallas_src>

<mosaic_0001>
module attributes {stable_mosaic.version = 11 : i64} {
  func.func @_lq_loss_kernel(%arg0: i32, %arg1: memref<8x32xf32, #tpu.memory_space<vmem>>, %arg2: memref<8x1xi32, #tpu.memory_space<vmem>>, %arg3: memref<8x128xf32, #tpu.memory_space<vmem>>) attributes {dimension_semantics = [#tpu.dimension_semantics<parallel>], iteration_bounds = array<i64: 2>, scalar_prefetch = 0 : i64, scratch_operands = 0 : i64, tpu.core_type = #tpu.core_type<tc>, window_params = [{transform_indices = @transform_0, window_bounds = array<i64: 8, 32>}, {transform_indices = @transform_1, window_bounds = array<i64: 8, 1>}, {transform_indices = @transform_2, window_bounds = array<i64: 8, 128>}]} {
    %c0 = arith.constant 0 : index
    %c0_0 = arith.constant 0 : index
    %0 = vector.load %arg1[%c0, %c0_0] : memref<8x32xf32, #tpu.memory_space<vmem>>, vector<8x32xf32>
    %cst = arith.constant dense<0xFF800000> : vector<8xf32>
    %1 = vector.multi_reduction <maximumf>, %0, %cst [1] : vector<8x32xf32> to vector<8xf32>
    %2 = vector.shape_cast %1 : vector<8xf32> to vector<8x1xf32>
    %3 = vector.broadcast %2 : vector<8x1xf32> to vector<8x32xf32>
    %4 = arith.subf %0, %3 : vector<8x32xf32>
    %5 = math.exp %4 : vector<8x32xf32>
    %cst_1 = arith.constant dense<0.000000e+00> : vector<8xf32>
    %6 = vector.multi_reduction <add>, %5, %cst_1 [1] : vector<8x32xf32> to vector<8xf32>
    %7 = vector.shape_cast %6 : vector<8xf32> to vector<8x1xf32>
    %8 = tpu.iota {dimensions = array<i32: 1>} : vector<8x32xi32>
    %c0_2 = arith.constant 0 : index
    %c0_3 = arith.constant 0 : index
    %9 = vector.load %arg2[%c0_2, %c0_3] : memref<8x1xi32, #tpu.memory_space<vmem>>, vector<8x1xi32>
    %10 = vector.broadcast %9 : vector<8x1xi32> to vector<8x32xi32>
    %11 = arith.cmpi eq, %8, %10 : vector<8x32xi32>
    %cst_4 = arith.constant 0.000000e+00 : f32
    %12 = vector.broadcast %cst_4 : f32 to vector<8x32xf32>
    %13 = arith.select %11, %5, %12 : vector<8x32xi1>, vector<8x32xf32>
    %cst_5 = arith.constant dense<0.000000e+00> : vector<8xf32>
    %14 = vector.multi_reduction <add>, %13, %cst_5 [1] : vector<8x32xf32> to vector<8xf32>
    %15 = vector.shape_cast %14 : vector<8xf32> to vector<8x1xf32>
    %16 = tpu.reciprocal %7 : vector<8x1xf32> -> vector<8x1xf32>
    %17 = arith.mulf %15, %16 : vector<8x1xf32>
    %cst_6 = arith.constant 9.99999993E-9 : f32
    %18 = vector.broadcast %cst_6 : f32 to vector<8x1xf32>
    %19 = arith.addf %17, %18 : vector<8x1xf32>
    %20 = math.sqrt %19 : vector<8x1xf32>
    %cst_7 = arith.constant 1.000000e+00 : f32
    %21 = vector.broadcast %cst_7 : f32 to vector<8x1xf32>
    %22 = arith.subf %21, %20 : vector<8x1xf32>
    %cst_8 = arith.constant 2.000000e+00 : f32
    %23 = vector.broadcast %cst_8 : f32 to vector<8x1xf32>
    %24 = arith.mulf %22, %23 : vector<8x1xf32>
    %25 = vector.shape_cast %24 : vector<8x1xf32> to vector<1x8x1xf32>
    %cst_9 = arith.constant dense<0.000000e+00> : vector<1xf32>
    %26 = vector.multi_reduction <add>, %25, %cst_9 [1, 2] : vector<1x8x1xf32> to vector<1xf32>
    %27 = vector.shape_cast %26 : vector<1xf32> to vector<1x1x1xf32>
    %28 = vector.extract %27[0, 0, 0] : f32 from vector<1x1x1xf32>
    %29 = vector.broadcast %28 : f32 to vector<8x128xf32>
    %c0_10 = arith.constant 0 : index
    %c0_11 = arith.constant 0 : index
    %30 = vector.load %arg3[%c0_10, %c0_11] : memref<8x128xf32, #tpu.memory_space<vmem>>, vector<8x128xf32>
    tpu.vector_store %arg3[%c0_10, %c0_11], %29 {strides = array<i32>} : memref<8x128xf32, #tpu.memory_space<vmem>>, vector<8x128xf32>,
    return
  }
  func.func @transform_0(%arg0: i32) -> (i32, i32) {
    %c0_i32 = arith.constant 0 : i32
    %c0_i32_0 = arith.constant 0 : i32
    return %arg0, %c0_i32 : i32, i32
  }
  func.func @transform_1(%arg0: i32) -> (i32, i32) {
    %c0_i32 = arith.constant 0 : i32
    %c0_i32_0 = arith.constant 0 : i32
    return %arg0, %c0_i32 : i32, i32
  }
  func.func @transform_2(%arg0: i32) -> (i32, i32) {
    %c0_i32 = arith.constant 0 : i32
    %c0_i32_0 = arith.constant 0 : i32
    return %arg0, %c0_i32 : i32, i32
  }
}

</mosaic_0001>

<bundles_post_ra>
// kernel: tpu_custom_call.1
= control target key start
LH: loop header
LB: loop body
LE: loop exit
PB: predicated region body
PF: predicated region fallthrough
CT: control target
= control target key end

     0   :  { %7 = vsyncpa [#allocation3], 0  ;;  %s535_s0 = inlined_call_operand.vmem [shape: f32[16,32], index: 0, kind: input, shape index: {}]   ;;  %s536_s1 = inlined_call_operand.vmem [shape: s32[16,1], index: 1, kind: input, shape index: {}]   ;;  %s537_s2 = inlined_call_operand.hbm [shape: f32[16,128], index: 2, kind: output, shape index: {}]  }
   0x1   :  { %9 = vsyncpa [#allocation3 + $0x1], 0  ;;  %s429_s9 = smov 0   ;;  %s431_s10 = smov 0  }
   0x2   :  { %s433_s11 = smov 0   ;;  %s435_s12 = smov 0  }
   0x3 LB: > { %s450_s13 = sadd.s32 4294967295, %s410_s12   ;;  %s288_s14 = sadd.s32 4294967294, %s410_s12   ;;  %s410_s12 = sphi %s435_s12, %s543_s12   ;;  %s406_s11 = sphi %s433_s11, %s542_s11   ;;  %s402_s10 = sphi %s431_s10, %s541_s10   ;;  %s398_s9 = sphi %s429_s9, %s540_s9  }
   0x4   : > { %s454_s15 = sadd.s32 1, %s410_s12   ;;  %s74_s16 = sadd.s32 1, %s406_s11 }
   0x5   : > { %s71_s17 = ssub.s32 %s410_s12, %s454_s15  ;;  %p84_p0 = scmp.ne.s32.totalorder %s406_s11, %s402_s10 }
   0x6   : > { %p72_p1 = scmp.eq.s32.totalorder %s71_s17, 0  ;;  %p85_p2 = scmp.eq.s32.totalorder %s450_s13, 1 }
   0x7   : > { %p90_p3 = scmp.ne.s32.totalorder %s402_s10, %s398_s9  ;;  %p91_p4 = scmp.eq.s32.totalorder %s288_s14, 1 }
   0x8   : > { %s465_s18 = scalar_select %p72_p1, %s406_s11, %s74_s16  }
   0x9   : > { %p467_p5 = por %p85_p2, %p84_p0  ;;  %p471_p6 = por %p91_p4, %p90_p3 }
   0xa   : > { %p291_p7 = scmp.ge.s32.totalorder %s410_s12, 1  ;;  %p123_p8 = scmp.lt.s32.totalorder %s410_s12, 3 }
   0xc   : > { %p124_p9 = pnand %p291_p7, %p123_p8 }
   0xd   : > { %p148_p10 = scmp.lt.s32.totalorder (!%p124_p9), %s450_s13, 1  ;;  %v412_v0 = vmov (!%p124_p9), 0   ;;  %vm157_vm0 = vcmask (!%p124_p9), 261120   ;;  %v167_v7 = vlaneseq (!%p124_p9)  ;;  %vm190_vm4 = vcmask (!%p124_p9), 7168   ;;  %s145_s29 = sand.u32 (!%p124_p9), 1, %s402_s10  }
   0xe   : > { %127 = sbr.rel (%p124_p9) target bundleno = 581 (0x245), region = 28  ;;  %341 = vset.pattern.permute.xlu0 (!%p124_p9), %v412_v0  ;;  %s292_s30 = sshll.u32 (!%p124_p9), %s145_s29, 3 }
   0xf   : > { %v168_v8 = vand.u32 (!%p124_p9), 127, %v167_v7  ;;  %s147_s3 = scalar_lea.vmem (!%p124_p9), [#allocation2], %s292_s30  ;;  %s296_s5 = sshll.u32 (!%p124_p9), %s450_s13, 7 }
  0x10   : > { %s217_s4 = sshll.u32 (!%p124_p9), %s147_s3, 4  ;;  %s495_s14 = scalar_lea.hbm (!%p124_p9), %s537_s2, %s296_s5  ;;  %s490_s4 = int_to_ptr.vmem [resolvable:$true] %s217_s4 }
  0x11   : > { %s204_s16 = scalar_lea.sflag (!%p124_p9), [#allocation3], %s145_s29  ;;  %s348_s17 = scalar_lea.vmem (!%p124_p9), %s490_s4, 128 }
  0x12   : > { %p349_p11 = scmp.ne.s32.totalorder (!%p124_p9), %s490_s4, %s348_s17 }
  0x14   : > { %p350_p12 = pnand (!%p124_p9), %p349_p11, %p467_p5 }
  0x15   : > { %s149_s21 = scalar_select %p148_p10, %s450_s13, 1 }
  0x16   : > { %p351_p13 = pneg %p350_p12  ;;  %s413_s13 = smov [#allocation2]  }
  0x17   : > { %s293_s22 = sshll.u32 %s149_s21, 3  ;;  %s352_s21 = sshll.u32 %s413_s13, 4  ;;  %s353_s21 = int_to_ptr.vmem [resolvable:$false] %s352_s21 }
  0x18   : > { %s151_s25 = scalar_lea.vmem %s535_s0, %s293_s22  ;;  %s155_s28 = scalar_lea.vmem %s536_s1, %s293_s22 }
  0x19   : > { %v156_v1 = vld [vmem:[%s151_s25] sm:$0xff]  ;;  %s354_s22 = scalar_lea.vmem %s353_s21, 256  ;;  %p355_p0 = scmp.lt.s32.totalorder %s490_s4, %s353_s21 }
  0x1a   : > { %v158_v2 = vsel %vm157_vm0, %v156_v1, -inf  ;;  %v169_v3 = vld [vmem:[%s155_s28] sm:$0xff]  ;;  %p356_p1 = scmp.lt.s32.totalorder %s354_s22, %s348_s17 }
  0x1b   : > { %159 = vmax.xlane.f32.xlu0 %v158_v2 }
  0x1c   : > { %p357_p2 = por %p356_p1, %p355_p0 }
  0x1e   : > { %p358_p3 = pnand %p357_p2, %p351_p13 }
  0x31   : > { %171 = vperm.xlu0 %341, %v169_v3  }
  0xa8   : > { %v160_v4 = vpop.xlane.xlu0 %159 }
  0xa9   : > { %v161_v5 = vsub.f32 %v156_v1, %v160_v4 }
  0xab   : > { %v162_v6 = vmul.f32 1.442695, %v161_v5 }
  0xad   : > { %342 = vpow2.f32 %v162_v6 }
  0xb0   : > { %v172_v9 = vpop.permute.xlu0 %171 }
  0xb1   : > { %vm173_vm1 = vcmp.eq.s32.totalorder %v168_v8, %v172_v9 }
  0xb7   : > { %v343_v10 = vpop.eup %342 }
  0xb8   : > { %v164_v11 = vsel %vm157_vm0, %v343_v10, 0.0  ;;  %v174_v12 = vsel %vm173_vm1, %v343_v10, 0.0 }
  0xb9   : > { %165 = vadd.xlane.f32.xlu1 %v164_v11  ;;  %v175_v13 = vsel %vm157_vm0, %v174_v12, 0.0 }
  0xbd   : > { %176 = vadd.xlane.f32.xlu1 %v175_v13 }
 0x146   : > { %v166_v14 = vpop.xlane.xlu1 %165 }
 0x147   : > { %344 = vrcp.f32 %v166_v14 }
 0x14a   : > { %v177_v16 = vpop.xlane.xlu1 %176 }
 0x151   : > { %v345_v15 = vpop.eup %344 }
 0x152   : > { %v179_v17 = vmul.f32 %v345_v15, %v177_v16 }
 0x154   : > { %v180_v18 = vadd.f32 1e-08, %v179_v17 }
 0x156   : > { %346 = vrsqrt.f32 %v180_v18  ;;  %vm183_vm2 = vcmp.eq.f32.partialorder %v180_v18, inf  ;;  %v186_v21 = vand.u32 2147483648, %v180_v18  ;;  %vm185_vm3 = vcmp.eq.f32.partialorder %v180_v18, 0.0 }
 0x160   : > { %v347_v19 = vpop.eup %346 }
 0x161   : > { %v182_v20 = vmul.f32 %v347_v19, %v180_v18 }
 0x163   : > { %v184_v22 = vsel %vm183_vm2, %v180_v18, %v182_v20 }
 0x164   : > { %v187_v23 = vsel %vm185_vm3, %v186_v21, %v184_v22 }
 0x165   : > { %v188_v24 = vsub.f32 1.0, %v187_v23 }
 0x167   : > { %v189_v25 = vmul.f32 2.0, %v188_v24 }
 0x169   : > { %v191_v26 = vsel %vm190_vm4, %v189_v25, 0.0 }
 0x16a   : > { %192 = vadd.xlane.f32.xlu1 %v191_v26 }
 0x1f7   : > { %v193_v27 = vpop.xlane.xlu1 %192 }
 0x1f8   : > { %v194_v28 = vrot.slane %v193_v27, 4 }
 0x1fa   : > { %v195_v29 = vadd.f32 %v194_v28, %v193_v27 }
 0x1fc   : > { %v196_v30 = vrot.slane %v195_v29, 2 }
 0x1fe   : > { %v197_v31 = vadd.f32 %v196_v30, %v195_v29 }
 0x200   : > { %v198_v32 = vrot.slane %v197_v31, 1 }
 0x202   : > { %v199_v33 = vadd.f32 %v198_v32, %v197_v31 }
 0x204   : > { %299 = vpush %v199_v33 }
 0x235   : > { %s300_s6 = spop %299 }
 0x236   : > { %v201_v34 = vstv %s300_s6 }
 0x237   : > { %202 = vst [vmem:[%s147_s3] sm:$0xff] %v201_v34 }
 0x238   : > { %361 = shalt.err (!%p358_p3)
}
 0x239   : > { %s362_s23 = scalar_lea.hbm %s495_s14, 128  ;;  %s366_s26 = scalar_lea.hbm %s537_s2, 256 }
 0x23a   : > { %p363_p4 = scmp.ne.s32.totalorder %s495_s14, %s362_s23  ;;  %p367_p9 = scmp.lt.u32.totalorder %s495_s14, %s537_s2 }
 0x23b   : > { %p368_p10 = scmp.lt.u32.totalorder %s366_s26, %s362_s23  ;;  %p370_p12 = scmp.lt.u32.totalorder %s362_s23, %s495_s14 }
 0x23c   : > { %p364_p7 = pnand %p363_p4, %p467_p5 }
 0x23d   : > { %p369_p11 = por %p368_p10, %p367_p9 }
 0x23e   : > { %p365_p8 = pneg %p364_p7 }
 0x23f   : > { %p371_p13 = por %p370_p12, %p369_p11 }
 0x241   : > { %p372_p0 = pnand %p371_p13, %p365_p8 }
 0x243   : > { %375 = shalt.err (!%p372_p0)
}
 0x244   : > { %301 = dma.vmem_to_hbm [thread:$0]  (%p467_p5), %s490_s4, 128, %s495_s14, %s204_s16  }
 0x245 PF: > { %p307_p1 = scmp.ge.s32.totalorder %s410_s12, 2  ;;  %s229_s29 = sand.u32 1, %s398_s9  }
 0x246   : > { %s230_s30 = scalar_lea.sflag [#allocation3], %s229_s29 }
 0x247   : > { %p304_p2 = pnand %p307_p1, %p471_p6 }
 0x249   : > { %393 = dma.done.wait (!%p304_p2), %s230_s30, 128  }
 0x24a   : > { %395 = vsyncadd (!%p304_p2), %s230_s30, 4294967168  ;;  %p12_p3 = scmp.ge.s32.totalorder %s454_s15, 4   ;;  %s540_s9 = smov %s402_s10 }
 0x24b   : > { %s541_s10 = smov %s406_s11  ;;  %s542_s11 = smov %s465_s18 }
 0x24c   : > { %s543_s12 = smov %s454_s15  ;;  %14 = sbr.rel (!%p12_p3) target bundleno = 3 (0x3), region = 66 }
 0x253   :  { %235 = vsyncpa [#allocation3], 1 }
 0x254   :  { %237 = vsyncpa [#allocation3 + $0x1], 1 }

</bundles_post_ra>
